<compile_context>
chip_gen: v6e
topology: v6e:2x2x1
jax: 0.10.0
libtpu: 0.0.40
codegen_flags: <defaults>
</compile_context>

<pallas_src>
import functools

import jax
import jax.numpy as jnp
from jax.experimental import pallas as pl
from jax.experimental.pallas import tpu as pltpu


def _round_up(x, m):
    return (x + m - 1) // m * m


def _vmem_budget_bytes():
    """Generation-aware VMEM budget: 75% of physical per-core VMEM.

    ~48 MiB on v7x (64 MiB physical), ~96 MiB on v5e/v6e (128 MiB physical).
    Falls back to a conservative v7x-sized budget if the query fails.
    """
    phys = None
    try:
        info = pltpu.get_tpu_info()
        phys = getattr(info, "vmem_capacity_bytes", None)
    except Exception:
        phys = None
    if not phys:
        phys = 64 * 1024 * 1024
    return int(phys) * 3 // 4


# --------------------- Tiled, grouped linear (matmul) kernel ---------------- #
def _linear_kernel(x_ref, w_ref, b_ref, o_ref, acc_ref):
    # grid = (G, M/tm, N/tn, K/tk); K is the innermost reduction axis and MUST
    # stay innermost + "arbitrary" for the scratch accumulator to be valid.
    @pl.when(pl.program_id(3) == 0)
    def _init():
        acc_ref[...] = jnp.zeros_like(acc_ref)

    # bf16 MXU inputs, f32 accumulation.
    acc_ref[...] += jnp.dot(
        x_ref[0].astype(jnp.bfloat16),
        w_ref[0].astype(jnp.bfloat16),
        preferred_element_type=jnp.float32,
    )

    @pl.when(pl.program_id(3) == pl.num_programs(3) - 1)
    def _store():
        o_ref[0] = (acc_ref[...] + b_ref[0]).astype(o_ref.dtype)


def batched_linear(x, w, b, *, tm=512, tn=512, tk=512):
    """x: (G, M, Ein), w: (G, Ein, Eout), b: (G, Eout) -> (G, M, Eout)."""
    G, M, Ein = x.shape
    Eout = w.shape[-1]

    # Clip tiles to the (padded) problem size; pad arrays so tiles divide.
    tm = min(tm, _round_up(M, 8))
    tn = min(tn, _round_up(Eout, 128))
    tk = min(tk, _round_up(Ein, 128))
    Mp, Kp, Np = _round_up(M, tm), _round_up(Ein, tk), _round_up(Eout, tn)

    xp = jnp.pad(x, ((0, 0), (0, Mp - M), (0, Kp - Ein)))
    wp = jnp.pad(w, ((0, 0), (0, Kp - Ein), (0, Np - Eout)))
    bp = jnp.pad(b, ((0, 0), (0, Np - Eout))).reshape(G, 1, Np)

    out = pl.pallas_call(
        _linear_kernel,
        out_shape=jax.ShapeDtypeStruct((G, Mp, Np), x.dtype),
        grid=(G, Mp // tm, Np // tn, Kp // tk),
        in_specs=[
            pl.BlockSpec((1, tm, tk), lambda g, i, j, k: (g, i, k)),
            pl.BlockSpec((1, tk, tn), lambda g, i, j, k: (g, k, j)),
            pl.BlockSpec((1, 1, tn), lambda g, i, j, k: (g, 0, j)),
        ],
        out_specs=pl.BlockSpec((1, tm, tn), lambda g, i, j, k: (g, i, j)),
        scratch_shapes=[pltpu.VMEM((tm, tn), jnp.float32)],
        compiler_params=pltpu.CompilerParams(
            dimension_semantics=("parallel", "parallel", "parallel", "arbitrary"),
            vmem_limit_bytes=_vmem_budget_bytes(),
        ),
    )(xp, wp, bp)
    return out[:, :M, :Eout]


def linear(x, w, b):
    """x: (M, Ein), w: (Ein, Eout), b: (Eout,) -> (M, Eout)."""
    return batched_linear(x[None], w[None], b[None])[0]


# ---------------------------- Attention kernel ------------------------------ #
def _attn_kernel(*refs, scale, has_mask, has_bias):
    it = iter(refs)
    q_ref = next(it)
    k_ref = next(it)
    v_ref = next(it)
    mask_ref = next(it) if has_mask else None
    bias_ref = next(it) if has_bias else None
    o_ref = next(it)
    attn_ref = next(it)

    # bf16 MXU inputs; f32 accumulation and f32 softmax (VPU/EUP) math.
    q = q_ref[0].astype(jnp.bfloat16)            # (H, tq, D)
    k = k_ref[0].astype(jnp.bfloat16)            # (H, Lk, D)

    # QK^T batched over heads; K consumed in stored (Lk, D) layout (no k.T).
    s = jnp.einsum("hqd,hkd->hqk", q, k, preferred_element_type=jnp.float32)
    s = s * scale
    if has_bias:
        s = s + bias_ref[0]                      # (Bh, tq, Lk) implicit bcast
    if has_mask:
        # int8 0/1 mask -> additive penalty (masked => -1e9), f32 on the VPU.
        pen = (mask_ref[0].astype(jnp.float32) - 1.0) * jnp.float32(1e9)
        s = s + pen                              # (Mh, tq, Lk) implicit bcast

    m = jnp.max(s, axis=-1, keepdims=True)
    e = jnp.exp(s - m)
    denom = jnp.sum(e, axis=-1, keepdims=True)
    attn = e * pl.reciprocal(denom, approx=True)  # divide on the EUP slot

    out = jnp.einsum(
        "hqk,hkd->hqd",
        attn.astype(jnp.bfloat16),
        v_ref[0].astype(jnp.bfloat16),
        preferred_element_type=jnp.float32,
    )

    attn_ref[0] = attn.astype(attn_ref.dtype)
    o_ref[0] = out.astype(o_ref.dtype)


# -------------------------------- Wrapper ----------------------------------- #
def self_attention(value, key, query, mask, params, heads, alibi_bias=None,
                   attn_dtype=jnp.float32):
    N, Lv, E = value.shape
    Lk = key.shape[1]
    Lq = query.shape[1]
    D = E // heads
    assert D * heads == E, "embed_size must be divisible by heads"
    assert Lk == Lv, "key/value sequence lengths must match"

    # ---- Q/K/V projections --------------------------------------------------
    if (value is key) and (key is query):
        # True self-attention: fuse at the weight level -> one (M,E)x(E,3E)
        # matmul, no stacked activation copy, 3x wider MXU N dimension.
        x = query.reshape(N * Lq, E)
        w_qkv = jnp.concatenate([params["wq"], params["wk"], params["wv"]], axis=1)
        b_qkv = jnp.concatenate([params["bq"], params["bk"], params["bv"]])
        y = linear(x, w_qkv, b_qkv)                          # (M, 3E)
        q = y[:, 0 * E:1 * E].reshape(N, Lq, heads, D)
        k = y[:, 1 * E:2 * E].reshape(N, Lk, heads, D)
        v = y[:, 2 * E:3 * E].reshape(N, Lv, heads, D)
    elif value.shape == key.shape == query.shape:
        # Distinct tensors, same shape: one batched (G=3) pallas_call.
        x3 = jnp.stack([
            value.reshape(N * Lv, E),
            key.reshape(N * Lk, E),
            query.reshape(N * Lq, E),
        ])
        w3 = jnp.stack([params["wv"], params["wk"], params["wq"]])
        b3 = jnp.stack([params["bv"], params["bk"], params["bq"]])
        y3 = batched_linear(x3, w3, b3)
        v = y3[0].reshape(N, Lv, heads, D)
        k = y3[1].reshape(N, Lk, heads, D)
        q = y3[2].reshape(N, Lq, heads, D)
    else:
        v = linear(value.reshape(N * Lv, E), params["wv"], params["bv"]).reshape(N, Lv, heads, D)
        k = linear(key.reshape(N * Lk, E), params["wk"], params["bk"]).reshape(N, Lk, heads, D)
        q = linear(query.reshape(N * Lq, E), params["wq"], params["bq"]).reshape(N, Lq, heads, D)

    # (N, L, H, D) -> (N, H, L, D)
    # TODO(synk): fold these layout shuffles (and the out_h one below) into the
    # kernels via an in-VMEM relayout (pltpu.einshape) to save the remaining
    # full-tensor HBM round trips; kept as XLA transposes for robust lowering.
    v = jnp.transpose(v, (0, 2, 1, 3))
    k = jnp.transpose(k, (0, 2, 1, 3))
    q = jnp.transpose(q, (0, 2, 1, 3))

    # ---- Optional mask (int8 stream) / alibi bias (f32 stream) --------------
    has_mask = mask is not None
    has_bias = alibi_bias is not None

    mask_i8 = None
    bias_f32 = None
    Mn = Mh = Bn = Bh = 1
    if has_mask:
        m4 = jnp.asarray(mask)
        while m4.ndim < 4:
            m4 = m4[None]
        m4 = jnp.broadcast_to(m4, m4.shape[:2] + (Lq, Lk))
        mask_i8 = (m4 != 0).astype(jnp.int8)     # 0/1, 1 byte/elt HBM stream
        Mn, Mh = mask_i8.shape[0], mask_i8.shape[1]
    if has_bias:
        b4 = jnp.asarray(alibi_bias, jnp.float32)
        while b4.ndim < 4:
            b4 = b4[None]
        b4 = jnp.broadcast_to(b4, b4.shape[:2] + (Lq, Lk))
        bias_f32 = b4
        Bn, Bh = b4.shape[0], b4.shape[1]

    # ---- tq derived from the real per-grid-step VMEM footprint --------------
    budget = _vmem_budget_bytes()
    attn_bytes = jnp.dtype(attn_dtype).itemsize
    Dp = _round_up(D, 128)        # lane padding of the trailing head_dim
    Lkp = _round_up(Lk, 128)      # lane padding of the trailing Lk dim
    resident = 2 * 2 * heads * Lkp * Dp * 4             # K + V, double-buffered
    per_row = (2 * heads * Dp * 4                        # q stream
               + 2 * heads * Dp * 4                      # out stream
               + 2 * heads * Lkp * attn_bytes            # attn-matrix writeback
               + 3 * heads * Lkp * 4)                    # s / e / pen temporaries
    if has_mask:
        per_row += 2 * Mh * Lkp * 1
    if has_bias:
        per_row += 2 * Bh * Lkp * 4
    margin = 4 * 1024 * 1024                             # compiler internal scratch
    avail = budget - resident - margin
    tq_cap = (avail // per_row) // 8 * 8 if avail > 0 else 0
    tq = int(max(8, min(_round_up(Lq, 8), tq_cap, 1024)))
    Lqp = _round_up(Lq, tq)
    nq = Lqp // tq

    if Lqp != Lq:
        q = jnp.pad(q, ((0, 0), (0, 0), (0, Lqp - Lq), (0, 0)))
        if has_mask:
            mask_i8 = jnp.pad(mask_i8, ((0, 0), (0, 0), (0, Lqp - Lq), (0, 0)))
        if has_bias:
            bias_f32 = jnp.pad(bias_f32, ((0, 0), (0, 0), (0, Lqp - Lq), (0, 0)))

    def _bcast_map(bn):
        if bn > 1:
            return lambda n, qi: (n, 0, qi, 0)
        return lambda n, qi: (0, 0, qi, 0)

    scale = 1.0 / (float(E) ** 0.5)

    in_arrays = [q, k, v]
    in_specs = [
        pl.BlockSpec((1, heads, tq, D), lambda n, qi: (n, 0, qi, 0)),
        pl.BlockSpec((1, heads, Lk, D), lambda n, qi: (n, 0, 0, 0)),
        pl.BlockSpec((1, heads, Lv, D), lambda n, qi: (n, 0, 0, 0)),
    ]
    if has_mask:
        in_arrays.append(mask_i8)
        in_specs.append(pl.BlockSpec((1, Mh, tq, Lk), _bcast_map(Mn)))
    if has_bias:
        in_arrays.append(bias_f32)
        in_specs.append(pl.BlockSpec((1, Bh, tq, Lk), _bcast_map(Bn)))

    kernel = functools.partial(_attn_kernel, scale=scale,
                               has_mask=has_mask, has_bias=has_bias)

    out_h, attn = pl.pallas_call(
        kernel,
        out_shape=(
            jax.ShapeDtypeStruct((N, heads, Lqp, D), query.dtype),
            jax.ShapeDtypeStruct((N, heads, Lqp, Lk), attn_dtype),
        ),
        grid=(N, nq),
        in_specs=in_specs,
        out_specs=(
            pl.BlockSpec((1, heads, tq, D), lambda n, qi: (n, 0, qi, 0)),
            pl.BlockSpec((1, heads, tq, Lk), lambda n, qi: (n, 0, qi, 0)),
        ),
        compiler_params=pltpu.CompilerParams(
            dimension_semantics=("parallel", "parallel"),
            vmem_limit_bytes=budget,
        ),
    )(*in_arrays)

    if Lqp != Lq:
        out_h = out_h[:, :, :Lq, :]
        attn = attn[:, :, :Lq, :]

    # (N, H, Lq, D) -> (N, Lq, E) -> fc_out
    out = jnp.transpose(out_h, (0, 2, 1, 3)).reshape(N * Lq, E)
    out = linear(out, params["wo"], params["bo"]).reshape(N, Lq, E)
    return out, attn


# ---------------------------- Pure-JAX reference ---------------------------- #
def _reference(value, key, query, mask, params, heads, alibi_bias=None):
    N, Lv, E = value.shape
    Lk, Lq = key.shape[1], query.shape[1]
    D = E // heads
    v = (value @ params["wv"] + params["bv"]).reshape(N, Lv, heads, D)
    k = (key @ params["wk"] + params["bk"]).reshape(N, Lk, heads, D)
    q = (query @ params["wq"] + params["bq"]).reshape(N, Lq, heads, D)
    qk = jnp.einsum("nqhd,nkhd->nhqk", q, k)
    if mask is not None:
        qk = jnp.where(mask == 0, -jnp.inf, qk)
    attention = qk / (E ** 0.5)
    if alibi_bias is not None:
        attention = attention + alibi_bias
    attention = jax.nn.softmax(attention, axis=3)
    out = jnp.einsum("nhqk,nkhd->nqhd", attention, v).reshape(N, Lq, E)
    out = out @ params["wo"] + params["bo"]
    return out, attention


# ---------------------------------- Main ------------------------------------ #
if __name__ == "__main__":
    N, seq, embed_size, heads = 2, 8, 32, 2

    root = jax.random.PRNGKey(0)
    ks = jax.random.split(root, 12)

    def w_init(k):
        return (0.02 * jax.random.normal(k, (embed_size, embed_size))).astype(jnp.float32)

    def b_init(k):
        return (0.01 * jax.random.normal(k, (embed_size,))).astype(jnp.float32)

    params = {
        "wv": w_init(ks[0]), "bv": b_init(ks[1]),
        "wk": w_init(ks[2]), "bk": b_init(ks[3]),
        "wq": w_init(ks[4]), "bq": b_init(ks[5]),
        "wo": w_init(ks[6]), "bo": b_init(ks[7]),
    }

    value = jax.random.normal(ks[8], (N, seq, embed_size), jnp.float32)
    key_in = jax.random.normal(ks[9], (N, seq, embed_size), jnp.float32)
    query = jax.random.normal(ks[10], (N, seq, embed_size), jnp.float32)

    # causal mask, shape (N, 1, Lq, Lk), broadcast over heads (PyTorch style)
    mask = jnp.tril(jnp.ones((seq, seq), jnp.int32))[None, None].repeat(N, axis=0)
    alibi = 0.05 * jax.random.normal(ks[11], (1, heads, seq, seq), jnp.float32)

    # Tolerances loosened from 1e-4: bf16 MXU inputs + approx reciprocal.
    tol = dict(atol=1e-2, rtol=1e-2)

    # Case 1: distinct value/key/query + causal mask (batched G=3 projections,
    #         int8 mask stream).
    out, attn = self_attention(value, key_in, query, mask, params, heads)
    out = jax.block_until_ready(out)
    attn = jax.block_until_ready(attn)
    out_r, attn_r = _reference(value, key_in, query, mask, params, heads)
    assert jnp.allclose(out, out_r, **tol), "case1 output mismatch"
    assert jnp.allclose(attn, attn_r, **tol), "case1 attention mismatch"

    # Case 2: true self-attention (same tensor), no mask (weight-fused QKV,
    #         bias/mask-free attention kernel variant).
    out, attn = self_attention(query, query, query, None, params, heads)
    out = jax.block_until_ready(out)
    out_r, attn_r = _reference(query, query, query, None, params, heads)
    assert jnp.allclose(out, out_r, **tol), "case2 output mismatch"
    assert jnp.allclose(attn, attn_r, **tol), "case2 attention mismatch"

    # Case 3: true self-attention + alibi bias, no mask (f32 bias stream,
    #         head axis de-duplicated at the batch dim).
    out, attn = self_attention(query, query, query, None, params, heads,
                               alibi_bias=alibi)
    out = jax.block_until_ready(out)
    out_r, attn_r = _reference(query, query, query, None, params, heads,
                               alibi_bias=alibi)
    assert jnp.allclose(out, out_r, **tol), "case3 output mismatch"
    assert jnp.allclose(attn, attn_r, **tol), "case3 attention mismatch"

    print("KERNEL_OK")
</pallas_src>

<mosaic_0001>
module attributes {stable_mosaic.version = 11 : i64} {
  func.func @_linear_kernel(%arg0: i32, %arg1: i32, %arg2: i32, %arg3: i32, %arg4: memref<1x16x128xf32, #tpu.memory_space<vmem>>, %arg5: memref<1x128x128xf32, #tpu.memory_space<vmem>>, %arg6: memref<1x1x128xf32, #tpu.memory_space<vmem>>, %arg7: memref<1x16x128xf32, #tpu.memory_space<vmem>>, %arg8: memref<16x128xf32, #tpu.memory_space<vmem>>) attributes {dimension_semantics = [#tpu.dimension_semantics<parallel>, #tpu.dimension_semantics<parallel>, #tpu.dimension_semantics<parallel>, #tpu.dimension_semantics<arbitrary>], iteration_bounds = array<i64: 3, 1, 1, 1>, scalar_prefetch = 0 : i64, scratch_operands = 1 : i64, tpu.core_type = #tpu.core_type<tc>, window_params = [{transform_indices = @transform_0, window_bounds = array<i64: 1, 16, 128>}, {transform_indices = @transform_1, window_bounds = array<i64: 1, 128, 128>}, {transform_indices = @transform_2, window_bounds = array<i64: 1, 1, 128>}, {transform_indices = @transform_3, window_bounds = array<i64: 1, 16, 128>}]} {
    %c0_i32 = arith.constant 0 : i32
    %0 = arith.cmpi eq, %arg3, %c0_i32 : i32
    %1 = arith.extui %0 : i1 to i32
    %c0_i32_0 = arith.constant 0 : i32
    %2 = arith.cmpi ne, %1, %c0_i32_0 : i32
    scf.if %2 {
      %cst_12 = arith.constant 0.000000e+00 : f32
      %16 = vector.broadcast %cst_12 : f32 to vector<16x128xf32>
      %c0_13 = arith.constant 0 : index
      %c0_14 = arith.constant 0 : index
      %17 = vector.load %arg8[%c0_13, %c0_14] : memref<16x128xf32, #tpu.memory_space<vmem>>, vector<16x128xf32>
      tpu.vector_store %arg8[%c0_13, %c0_14], %16 {strides = array<i32>} : memref<16x128xf32, #tpu.memory_space<vmem>>, vector<16x128xf32>,
    } else {
    }
    %c0 = arith.constant 0 : index
    %c0_1 = arith.constant 0 : index
    %3 = vector.load %arg8[%c0, %c0_1] : memref<16x128xf32, #tpu.memory_space<vmem>>, vector<16x128xf32>
    %c0_2 = arith.constant 0 : index
    %c0_3 = arith.constant 0 : index
    %c0_4 = arith.constant 0 : index
    %4 = vector.load %arg4[%c0_2, %c0_3, %c0_4] : memref<1x16x128xf32, #tpu.memory_space<vmem>>, vector<1x16x128xf32>
    %5 = vector.shape_cast %4 : vector<1x16x128xf32> to vector<16x128xf32>
    %6 = arith.truncf %5 : vector<16x128xf32> to vector<16x128xbf16>
    %c0_5 = arith.constant 0 : index
    %c0_6 = arith.constant 0 : index
    %c0_7 = arith.constant 0 : index
    %7 = vector.load %arg5[%c0_5, %c0_6, %c0_7] : memref<1x128x128xf32, #tpu.memory_space<vmem>>, vector<1x128x128xf32>
    %8 = vector.shape_cast %7 : vector<1x128x128xf32> to vector<128x128xf32>
    %9 = arith.truncf %8 : vector<128x128xf32> to vector<128x128xbf16>
    %cst = arith.constant dense<0.000000e+00> : vector<16x128xf32>
    %10 = tpu.matmul %6, %9, %cst {dimension_numbers = #tpu.dot_dimension_numbers<[1], [0], [0], [1], [0, 0, 1, 1], [], []>} : vector<16x128xbf16>, vector<128x128xbf16>, vector<16x128xf32> -> vector<16x128xf32>
    %11 = arith.addf %3, %10 : vector<16x128xf32>
    %c0_8 = arith.constant 0 : index
    %c0_9 = arith.constant 0 : index
    %12 = vector.load %arg8[%c0_8, %c0_9] : memref<16x128xf32, #tpu.memory_space<vmem>>, vector<16x128xf32>
    tpu.vector_store %arg8[%c0_8, %c0_9], %11 {strides = array<i32>} : memref<16x128xf32, #tpu.memory_space<vmem>>, vector<16x128xf32>,
    %c0_i32_10 = arith.constant 0 : i32
    %13 = arith.cmpi eq, %arg3, %c0_i32_10 : i32
    %14 = arith.extui %13 : i1 to i32
    %c0_i32_11 = arith.constant 0 : i32
    %15 = arith.cmpi ne, %14, %c0_i32_11 : i32
    scf.if %15 {
      %c0_12 = arith.constant 0 : index
      %c0_13 = arith.constant 0 : index
      %16 = vector.load %arg8[%c0_12, %c0_13] : memref<16x128xf32, #tpu.memory_space<vmem>>, vector<16x128xf32>
      %c0_14 = arith.constant 0 : index
      %c0_15 = arith.constant 0 : index
      %c0_16 = arith.constant 0 : index
      %17 = vector.load %arg6[%c0_14, %c0_15, %c0_16] : memref<1x1x128xf32, #tpu.memory_space<vmem>>, vector<1x1x128xf32>
      %18 = vector.shape_cast %17 : vector<1x1x128xf32> to vector<1x128xf32>
      %19 = vector.broadcast %18 : vector<1x128xf32> to vector<16x128xf32>
      %20 = arith.addf %16, %19 : vector<16x128xf32>
      %c0_17 = arith.constant 0 : index
      %c0_18 = arith.constant 0 : index
      %c0_19 = arith.constant 0 : index
      %21 = vector.load %arg7[%c0_17, %c0_18, %c0_19] : memref<1x16x128xf32, #tpu.memory_space<vmem>>, vector<1x16x128xf32>
      %22 = vector.shape_cast %21 : vector<1x16x128xf32> to vector<16x128xf32>
      %23 = vector.shape_cast %20 : vector<16x128xf32> to vector<1x16x128xf32>
      tpu.vector_store %arg7[%c0_17, %c0_18, %c0_19], %23 {strides = array<i32>} : memref<1x16x128xf32, #tpu.memory_space<vmem>>, vector<1x16x128xf32>,
    } else {
    }
    return
  }
  func.func @transform_0(%arg0: i32, %arg1: i32, %arg2: i32, %arg3: i32) -> (i32, i32, i32) {
    %c0_i32 = arith.constant 0 : i32
    return %arg0, %arg1, %arg3 : i32, i32, i32
  }
  func.func @transform_1(%arg0: i32, %arg1: i32, %arg2: i32, %arg3: i32) -> (i32, i32, i32) {
    %c0_i32 = arith.constant 0 : i32
    return %arg0, %arg3, %arg2 : i32, i32, i32
  }
  func.func @transform_2(%arg0: i32, %arg1: i32, %arg2: i32, %arg3: i32) -> (i32, i32, i32) {
    %c0_i32 = arith.constant 0 : i32
    %c0_i32_0 = arith.constant 0 : i32
    return %arg0, %c0_i32, %arg2 : i32, i32, i32
  }
  func.func @transform_3(%arg0: i32, %arg1: i32, %arg2: i32, %arg3: i32) -> (i32, i32, i32) {
    %c0_i32 = arith.constant 0 : i32
    return %arg0, %arg1, %arg2 : i32, i32, i32
  }
}

</mosaic_0001>

<bundles_post_ra>
// kernel: tpu_custom_call.1
= control target key start
LH: loop header
LB: loop body
LE: loop exit
PB: predicated region body
PF: predicated region fallthrough
CT: control target
= control target key end

     0   :  { %s1050_s0 = inlined_call_operand.hbm [shape: f32[3,16,128], index: 0, kind: input, shape index: {}]   ;;  %s1051_s1 = inlined_call_operand.hbm [shape: f32[3,128,128], index: 1, kind: input, shape index: {}]   ;;  %s1052_s2 = inlined_call_operand.vmem [shape: f32[3,1,128], index: 2, kind: input, shape index: {}]   ;;  %s1053_s3 = inlined_call_operand.hbm [shape: f32[3,16,128], index: 3, kind: output, shape index: {}]  }
   0x1   :  { %1054 = sst [smem:[#allocation12_spill]] %s1050_s0 }
   0x2   :  { %8 = vsyncpa [#allocation4], 0 }
   0x3   :  { %10 = vsyncpa [#allocation4 + $0x1], 0 }
   0x4   :  { %11 = vsyncpa [#allocation7], 0 }
   0x5   :  { %13 = vsyncpa [#allocation7 + $0x1], 0 }
   0x6   :  { %14 = vsyncpa [#allocation5], 0 }
   0x7   :  { %16 = vsyncpa [#allocation5 + $0x1], 0  ;;  %s845_s12 = smov 0   ;;  %s847_s13 = smov 0  }
   0x8   :  { %s849_s14 = smov 0   ;;  %s851_s15 = smov 0  }
   0x9   :  { %s853_s16 = smov 0   ;;  %s855_s17 = smov 0  }
   0xa LB: > { %s549_s18 = sadd.s32 4294967295, %s814_s17   ;;  %s550_s19 = sadd.s32 4294967294, %s814_s17   ;;  %s814_s17 = sphi %s855_s17, %s22_s17   ;;  %s810_s16 = sphi %s853_s16, %s1066_s16   ;;  %s806_s15 = sphi %s851_s15, %s1065_s15   ;;  %s802_s14 = sphi %s849_s14, %s1064_s14   ;;  %s798_s13 = sphi %s847_s13, %s1063_s13   ;;  %s794_s12 = sphi %s845_s12, %s1062_s12  }
   0xb   : > { %s48_s20 = sadd.s32 1, %s810_s16  ;;  %s59_s21 = sadd.s32 1, %s802_s14 }
   0xc   : > { %p50_p0 = scmp.ge.s32.totalorder %s48_s20, 3  ;;  %p66_p1 = scmp.ne.s32.totalorder %s802_s14, %s798_s13 }
   0xd   : > { %p67_p2 = scmp.eq.s32.totalorder %s814_s17, 0  ;;  %p72_p3 = scmp.ne.s32.totalorder %s798_s13, %s794_s12 }
   0xe   : > { %s1068_s20 = smov (%p50_p0, %s48_s20), 0  ;;  %p73_p5 = scmp.eq.s32.totalorder %s549_s18, 0 }
   0xf   : > { %p886_p4 = por %p67_p2, %p66_p1  ;;  %s52_s23 = ssub.s32 %s810_s16, %s1068_s20 }
  0x10   : > { %p158_p6 = scmp.eq.s32.totalorder %s549_s18, 2  ;;  %p57_p7 = scmp.eq.s32.totalorder %s52_s23, 0 }
  0x11   : > { %p892_p8 = por %p73_p5, %p72_p3  ;;  %p164_p10 = scmp.eq.s32.totalorder %s550_s19, 2 }
  0x12   : > { %p896_p9 = por %p158_p6, %p66_p1  ;;  %p618_p12 = scmp.lt.s32.totalorder %s814_s17, 3 }
  0x13   : > { %s901_s26 = scalar_select %p57_p7, %s802_s14, %s59_s21  }
  0x14   : > { %p903_p11 = por %p164_p10, %p72_p3  ;;  %s909_s28 = sand.u32 1, %s802_s14  }
  0x15   : > { %s553_s29 = sshll.u32 %s909_s28, 4  ;;  %s569_s30 = sshll.u32 %s810_s16, 8 }
  0x16   : > { %s1059_s0 = sld [smem:[#allocation12_spill]]  ;;  %s188_s7 = scalar_lea.vmem [#allocation3], %s553_s29 }
  0x17   : > { %s198_s8 = sshll.u32 %s188_s7, 4  ;;  %p918_p13 = pnand %p618_p12, %p886_p4  ;;  %s199_s8 = int_to_ptr.vmem [resolvable:$true] %s198_s8 }
  0x18   : > { %p559_p0 = scmp.ge.s32.totalorder %s814_s17, 1  ;;  %s185_s10 = scalar_lea.sflag [#allocation4], %s909_s28 }
  0x19   : > { %p676_p1 = pneg %p918_p13  ;;  %s687_s11 = scalar_lea.vmem %s199_s8, 256 }
  0x1a   : > { %p688_p2 = scmp.ne.s32.totalorder %s199_s8, %s687_s11  ;;  %s816_s18 = smov [#allocation3]  }
  0x1b   : > { %s692_s19 = sshll.u32 %s816_s18, 4  ;;  %s693_s19 = int_to_ptr.vmem [resolvable:$false] %s692_s19 }
  0x1c   : > { %s197_s6 = scalar_lea.hbm %s1059_s0, %s569_s30  ;;  %p690_p3 = pnand %p688_p2, %p676_p1 }
  0x1d   : > { %s694_s21 = scalar_lea.vmem %s693_s19, 512  ;;  %p695_p4 = scmp.lt.s32.totalorder %s199_s8, %s693_s19 }
  0x1e   : > { %p691_p5 = pneg %p690_p3  ;;  %p696_p6 = scmp.lt.s32.totalorder %s694_s21, %s687_s11 }
  0x20   : > { %p697_p7 = por %p696_p6, %p695_p4 }
  0x22   : > { %p698_p10 = pnand %p697_p7, %p691_p5 }
  0x24   : > { %701 = shalt.err (!%p698_p10)
}
  0x25   : > { %s817_s22 = smov 128   ;;  %s818_s23 = smov 8  }
  0x26   : > { %610 = dma.hbm_to_vmem [thread:$0]  (!%p918_p13), %s197_s6, 256, %s199_s8, %s185_s10, %s817_s22, %s817_s22, %s818_s23  }
  0x27   : > { %p239_p12 = scmp.lt.s32.totalorder %s814_s17, 4  ;;  %s556_s29 = sshll.u32 %s909_s28, 7 }
  0x28   : > { %s570_s30 = sshll.u32 %s810_s16, 11  ;;  %s212_s18 = scalar_lea.vmem [#allocation6], %s556_s29 }
  0x29   : > { %p936_p2 = pnand %p559_p0, %p239_p12  ;;  %s221_s11 = scalar_lea.hbm %s1051_s1, %s570_s30 }
  0x2a   : > { %s222_s19 = sshll.u32 %s212_s18, 4  ;;  %s209_s21 = scalar_lea.sflag [#allocation7], %s909_s28  ;;  %s223_s19 = int_to_ptr.vmem [resolvable:$true] %s222_s19 }
  0x2b   : > { %s715_s0 = scalar_lea.vmem %s223_s19, 2048  ;;  %s819_s6 = smov [#allocation6]  }
  0x2c   : > { %p716_p3 = scmp.ne.s32.totalorder %s223_s19, %s715_s0  ;;  %s720_s8 = sshll.u32 %s819_s6, 4  ;;  %s721_s8 = int_to_ptr.vmem [resolvable:$false] %s720_s8 }
  0x2d   : > { %s722_s10 = scalar_lea.vmem %s721_s8, 4096  ;;  %p723_p0 = scmp.lt.s32.totalorder %s223_s19, %s721_s8 }
  0x2e   : > { %p718_p5 = pnand %p716_p3, %p676_p1  ;;  %p724_p6 = scmp.lt.s32.totalorder %s722_s10, %s715_s0 }
  0x30   : > { %p719_p4 = pneg %p718_p5  ;;  %p725_p7 = por %p724_p6, %p723_p0 }
  0x32   : > { %p726_p10 = pnand %p725_p7, %p719_p4 }
  0x34   : > { %729 = shalt.err (!%p726_p10)
}
  0x35   : > { %613 = dma.hbm_to_vmem [thread:$0]  (!%p918_p13), %s221_s11, 2048, %s223_s19, %s209_s21, %s817_s22, %s817_s22, %s818_s23  }
  0x36   : > { %243 = sbr.rel (%p936_p2) target bundleno = 310 (0x136), region = 32  ;;  %s952_s28 = sand.u32 (!%p936_p2), 1, %s798_s13  }
  0x37   : > { %s560_s29 = sshll.u32 (!%p936_p2), %s952_s28, 4  ;;  %s246_s30 = scalar_lea.sflag (!%p936_p2), [#allocation4], %s952_s28 }
  0x38   : > { %s958_s0 = scalar_lea.vmem (!%p936_p2), [#allocation3], %s560_s29 }
  0x3b   : > { %781 = dma.done.wait (%p892_p8), %s246_s30, 256  }
  0x3c   : > { %783 = vsyncadd (%p892_p8), %s246_s30, 4294967040  ;;  %s561_s9 = sshll.u32 %s952_s28, 7  ;;  %s255_s22 = scalar_lea.sflag [#allocation7], %s952_s28 }
  0x3d   : > { %s966_s23 = scalar_lea.vmem [#allocation6], %s561_s9 }
  0x3e   : > { %785 = dma.done.wait (%p892_p8), %s255_s22, 2048  }
  0x3f   : > { %787 = vsyncadd (%p892_p8), %s255_s22, 4294965248  ;;  %v820_v0 = vmov 0.0   ;;  %vm821_vm0 = vmmov 0   ;;  %v327_v1 = vld [vmem:[%s966_s23 + $0x70] sm:$0xff]  ;;  %v328_v2 = vld [vmem:[%s966_s23 + $0x78] sm:$0xff]  ;;  %p294_p8 = scmp.lt.s32.totalorder %s806_s15, 2 }
  0x40   : > { %581 = vmatprep.subr.bf16.mxu0 %v820_v0  ;;  %597 = vmatprep.mubr.msk.bf16.mxu0 %vm821_vm0, %v820_v0  ;;  %v325_v3 = vld [vmem:[%s966_s23 + $0x60] sm:$0xff]  ;;  %v336_v4 = vpack.c.bf16 %v328_v2, %v327_v1  ;;  %v326_v5 = vld [vmem:[%s966_s23 + $0x68] sm:$0xff]  ;;  %v323_v7 = vld [vmem:[%s966_s23 + $0x50] sm:$0xff]  ;;  %s291_s11 = scalar_lea.vmem [#allocation8], %s560_s29  ;;  %s571_s19 = sshll.u32 %s806_s15, 8 }
  0x41   : > { %v335_v6 = vpack.c.bf16 %v326_v5, %v325_v3  ;;  %v324_v8 = vld [vmem:[%s966_s23 + $0x58] sm:$0xff]  ;;  %v321_v10 = vld [vmem:[%s966_s23 + $0x40] sm:$0xff]  ;;  %v322_v11 = vld [vmem:[%s966_s23 + $0x48] sm:$0xff]  ;;  %s295_s24 = scalar_select %p294_p8, %s806_s15, 2 }
  0x42   : > { %582 = vmatpush3.bf16.msra.mxu0 %v336_v4  ;;  %v334_v9 = vpack.c.bf16 %v324_v8, %v323_v7  ;;  %v333_v12 = vpack.c.bf16 %v322_v11, %v321_v10  ;;  %v319_v13 = vld [vmem:[%s966_s23 + $0x30] sm:$0xff]  ;;  %v320_v14 = vld [vmem:[%s966_s23 + $0x38] sm:$0xff]  ;;  %v317_v16 = vld [vmem:[%s966_s23 + $0x20] sm:$0xff]  ;;  %s415_s18 = sshll.u32 %s291_s11, 4  ;;  %s1003_s8 = scalar_lea.hbm %s1053_s3, %s571_s19  ;;  %s998_s18 = int_to_ptr.vmem [resolvable:$true] %s415_s18 }
  0x43   : > { %583 = vmatprep.subr.bf16.mxu0 %v820_v0  ;;  %v332_v15 = vpack.c.bf16 %v320_v14, %v319_v13  ;;  %v318_v17 = vld [vmem:[%s966_s23 + $0x28] sm:$0xff]  ;;  %v315_v19 = vld [vmem:[%s966_s23 + $0x10] sm:$0xff]  ;;  %v316_v20 = vld [vmem:[%s966_s23 + $0x18] sm:$0xff]  ;;  %s299_s7 = scalar_lea.vmem %s1052_s2, %s295_s24  ;;  %s399_s10 = scalar_lea.sflag [#allocation5], %s952_s28 }
  0x44   : > { %v331_v18 = vpack.c.bf16 %v318_v17, %v317_v16  ;;  %v330_v21 = vpack.c.bf16 %v316_v20, %v315_v19  ;;  %v313_v22 = vld [vmem:[%s966_s23] sm:$0xff]  ;;  %v314_v23 = vld [vmem:[%s966_s23 + $0x8] sm:$0xff]  ;;  %s730_s29 = scalar_lea.vmem %s998_s18, 256  ;;  %s822_s15 = smov [#allocation8]  }
  0x45   : > { %v329_v24 = vpack.c.bf16 %v314_v23, %v313_v22  ;;  %v310_v25 = vld [vmem:[%s958_s0] sm:$0xff]  ;;  %v311_v26 = vld [vmem:[%s958_s0 + $0x8] sm:$0xff]  ;;  %p731_p13 = scmp.ne.s32.totalorder %s998_s18, %s730_s29  ;;  %s734_s30 = sshll.u32 %s822_s15, 4  ;;  %s735_s30 = int_to_ptr.vmem [resolvable:$false] %s734_s30 }
  0x46   : > { %584 = vmatpush3.bf16.msra.mxu0 %v335_v6  ;;  %v312_v27 = vpack.c.bf16 %v311_v26, %v310_v25  ;;  %v563_v28 = vld [vmem:[%s299_s7] ss:$0 sm:$0xff]  ;;  %s736_s0 = scalar_lea.vmem %s735_s30, 512  ;;  %p737_p2 = scmp.lt.s32.totalorder %s998_s18, %s735_s30 }
  0x47   : > { %585 = vmatprep.subr.bf16.mxu0 %v820_v0  ;;  %p732_p1 = pnand %p731_p13, %p896_p9  ;;  %p738_p3 = scmp.lt.s32.totalorder %s736_s0, %s730_s29 }
  0x49   : > { %p733_p12 = pneg %p732_p1  ;;  %p739_p5 = por %p738_p3, %p737_p2 }
  0x4a   : > { %586 = vmatpush3.bf16.msra.mxu0 %v334_v9 }
  0x4b   : > { %587 = vmatprep.subr.bf16.mxu0 %v820_v0  ;;  %p740_p4 = pnand %p739_p5, %p733_p12 }
  0x4e   : > { %588 = vmatpush3.bf16.msra.mxu0 %v333_v12 }
  0x4f   : > { %589 = vmatprep.subr.bf16.mxu0 %v820_v0 }
  0x52   : > { %590 = vmatpush3.bf16.msra.mxu0 %v332_v15 }
  0x53   : > { %591 = vmatprep.subr.bf16.mxu0 %v820_v0 }
  0x56   : > { %592 = vmatpush3.bf16.msra.mxu0 %v331_v18 }
  0x57   : > { %593 = vmatprep.subr.bf16.mxu0 %v820_v0 }
  0x5a   : > { %594 = vmatpush3.bf16.msra.mxu0 %v330_v21 }
  0x5b   : > { %595 = vmatprep.subr.bf16.mxu0 %v820_v0 }
  0x5e   : > { %596 = vmatpush3.bf16.msra.mxu0 %v329_v24 }
  0x61   : > { %598 = vmatmul.mubr.bf16.vlgmr.msra.gmra.mxu0 %v312_v27 }
 0x121   : > { %v371_v29 = vpop.f32.mrf.mxu0 }
 0x122   : > { %v394_v30 = vadd.f32 %v563_v28, %v371_v29 }
 0x123   : > { %v599_v31 = vpop.f32.mrf.mxu0 }
 0x124   : > { %396 = vst [vmem:[%s291_s11] sm:$0xff] %v394_v30 }
 0x125   : > { %v374_v32 = vpop.f32.mrf.mxu0 }
 0x126   : > { %v395_v33 = vadd.f32 %v563_v28, %v374_v32 }
 0x127   : > { %v600_v34 = vpop.f32.mrf.mxu0 }
 0x128   : > { %397 = vst [vmem:[%s291_s11 + $0x8] sm:$0xff] %v395_v33 }
 0x129   : > { %743 = shalt.err (!%p740_p4)
}
 0x12a   : > { %s744_s9 = scalar_lea.hbm %s1003_s8, 256  ;;  %s748_s24 = scalar_lea.hbm %s1053_s3, 768 }
 0x12b   : > { %p745_p0 = scmp.ne.s32.totalorder %s1003_s8, %s744_s9  ;;  %p749_p10 = scmp.lt.s32.totalorder %s1003_s8, %s1053_s3 }
 0x12c   : > { %p750_p8 = scmp.lt.s32.totalorder %s748_s24, %s744_s9 }
 0x12d   : > { %p746_p6 = pnand %p745_p0, %p896_p9 }
 0x12e   : > { %p751_p13 = por %p750_p8, %p749_p10 }
 0x12f   : > { %p747_p7 = pneg %p746_p6 }
 0x131   : > { %p752_p1 = pnand %p751_p13, %p747_p7 }
 0x133   : > { %755 = shalt.err (!%p752_p1)
}
 0x134   : > { %s823_s7 = smov 128   ;;  %s824_s11 = smov 8  }
 0x135   : > { %605 = dma.vmem_to_hbm [thread:$0]  (%p896_p9), %s998_s18, 256, %s1003_s8, %s399_s10, %s823_s7, %s823_s7, %s824_s11  }
 0x136 PF: > { %p619_p12 = scmp.ge.s32.totalorder %s814_s17, 2  ;;  %s430_s19 = sand.u32 1, %s794_s12  }
 0x137   : > { %s431_s21 = scalar_lea.sflag [#allocation5], %s430_s19 }
 0x138   : > { %p615_p2 = pnand %p619_p12, %p903_p11 }
 0x13a   : > { %p616_p3 = pneg %p615_p2 }
 0x13c   : > { %789 = dma.done.wait (%p616_p3), %s431_s21, 256  }
 0x13d   : > { %791 = vsyncadd (%p616_p3), %s431_s21, 4294967040  ;;  %s22_s17 = sadd.s32 1, %s814_s17   ;;  %s1062_s12 = smov %s798_s13 }
 0x13e   : > { %p19_p5 = scmp.ge.s32.totalorder %s22_s17, 5   ;;  %s1063_s13 = smov %s802_s14 }
 0x13f   : > { %s1064_s14 = smov %s901_s26  ;;  %s1065_s15 = smov %s810_s16 }
 0x140   : > { %s1066_s16 = smov %s1068_s20  ;;  %21 = sbr.rel (!%p19_p5) target bundleno = 10 (0xa), region = 101 }
 0x145   :  { %436 = vsyncpa [#allocation4], 1 }
 0x146   :  { %438 = vsyncpa [#allocation4 + $0x1], 1 }
 0x147   :  { %439 = vsyncpa [#allocation7], 1 }
 0x148   :  { %441 = vsyncpa [#allocation7 + $0x1], 1 }
 0x149   :  { %442 = vsyncpa [#allocation5], 1 }
 0x14a   :  { %444 = vsyncpa [#allocation5 + $0x1], 1 }

</bundles_post_ra>
